<compile_context>
chip_gen: v6e
topology: v6e:2x2x1
jax: 0.10.0
libtpu: 0.0.40
codegen_flags: <defaults>
</compile_context>

<pallas_src>
import functools
import math

import jax
import jax.numpy as jnp
from jax.experimental import pallas as pl
from jax.experimental.pallas import tpu as pltpu


def _round_up(x, m):
    return ((x + m - 1) // m) * m


def _num_tensorcores():
    """Best-effort count of TensorCores one 'parallel' grid axis can shard over."""
    try:
        kind = getattr(jax.devices()[0], "device_kind", "").lower()
    except Exception:
        return 1
    for tag in ("v7", "v4", "v5p"):   # 2-TC / megacore chips
        if tag in kind:
            return 2
    return 1                          # v5e / v6e: single TensorCore


def _choose_tile_b(batch, num_cores, embed_dim, hidden_dim):
    """Rows per grid step.

    * 1-TC chips: one grid step (the grid is a serial loop there; extra steps
      are pure ~600-cycle overhead).
    * 2-TC chips: exactly two tiles for non-tiny batches so both cores get
      work; tiny batches stay in one tile (splitting only inflates padding).
    * A VMEM-derived row cap bounds the tile for very large batches / dims.
    """
    b8 = _round_up(batch, 8)
    # Rough per-row f32 activation footprint (temb, h temps, out), generous.
    bytes_per_row = 4 * (2 + 3 * 2 * embed_dim + 3 * hidden_dim)
    cap = max(64, ((8 << 20) // bytes_per_row) // 8 * 8)   # ~8 MiB of activations
    cap = min(cap, 4096)

    if num_cores >= 2 and b8 > 32:
        tile = _round_up((b8 + 1) // 2, 8)     # two tiles, one per TensorCore
    else:
        tile = b8                              # single grid step
    if tile > cap:
        n_tiles = -(-b8 // cap)                # ceil
        tile = _round_up(-(-b8 // n_tiles), 8)
    return tile


# -----------------------------------------------------------------------------
# Fused kernel: sinusoidal embedding -> Linear -> Mish -> Linear
# -----------------------------------------------------------------------------
def _fused_kernel(t_ref, c_ref, w1_ref, b1_ref, w2_ref, b2_ref, o_ref):
    # t_ref: [TB, 2]  columns (t1 | t2)
    # c_ref: [3, 2E]  rows (freq_t1 | freq_t2 | phase) describing the
    #                 concatenated [sin1|cos1|sin2|cos2] lane layout.
    t1 = t_ref[:, 0:1]                       # [TB, 1]
    t2 = t_ref[:, 1:2]                       # [TB, 1]
    freq_a = c_ref[0:1, :]                   # [1, 2E]  freqs on t1 lanes, 0 on t2
    freq_b = c_ref[1:2, :]                   # [1, 2E]  freqs on t2 lanes, 0 on t1
    phase = c_ref[2:3, :]                    # [1, 2E]  pi/2 on cos lanes

    # Sinusoidal embedding for both timesteps with a single sin:
    # cos(x) == sin(x + pi/2).
    arg = t1 * freq_a + t2 * freq_b + phase
    temb = jnp.sin(arg)                      # [TB, 2E]

    # Linear 1: [TB, 2E] @ [2E, H] + [1, H]
    h = jnp.dot(temb, w1_ref[...],
                preferred_element_type=jnp.float32) + b1_ref[...]

    # Mish: h * tanh(softplus(h)) with one exp + approx EUP reciprocal.
    #   tanh(log(1+e)) = ((1+e)^2 - 1) / ((1+e)^2 + 1), e = exp(min(h, 20))
    # (for h > 20, mish(h) == h to f32 precision, so the clamp is exact).
    e = jnp.exp(jnp.minimum(h, 20.0))
    n = (1.0 + e) * (1.0 + e)
    h = h * ((n - 1.0) * pl.reciprocal(n + 1.0, approx=True))

    # Linear 2: [TB, H] @ [H, E] + [1, E]
    y = jnp.dot(h, w2_ref[...],
                preferred_element_type=jnp.float32) + b2_ref[...]
    o_ref[...] = y.astype(o_ref.dtype)


def dual_timestep_encoder_pallas(t1, t2, consts, w1, b1, w2, b2, *, embed_dim):
    """t1, t2: [B] timesteps; consts: [3, 2E]; weights as [in, out]; -> [B, E]."""
    B = int(t1.shape[0])
    in_dim, hidden_dim = w1.shape
    assert in_dim == 2 * embed_dim

    num_cores = _num_tensorcores()
    tile_b = _choose_tile_b(B, num_cores, embed_dim, hidden_dim)
    B_pad = _round_up(B, tile_b)
    grid = (B_pad // tile_b,)

    # Single packed [B, 2] timestep input (one DMA per grid step).
    t = jnp.stack([t1.astype(jnp.float32), t2.astype(jnp.float32)], axis=-1)
    if B_pad != B:
        t = jnp.pad(t, ((0, B_pad - B), (0, 0)))

    out = pl.pallas_call(
        _fused_kernel,
        out_shape=jax.ShapeDtypeStruct((B_pad, embed_dim), jnp.float32),
        grid_spec=pltpu.PrefetchScalarGridSpec(
            num_scalar_prefetch=0,
            grid=grid,
            in_specs=[
                pl.BlockSpec((tile_b, 2), lambda i: (i, 0)),              # t1|t2
                pl.BlockSpec((3, in_dim), lambda i: (0, 0)),              # consts
                pl.BlockSpec((in_dim, hidden_dim), lambda i: (0, 0)),     # W1
                pl.BlockSpec((1, hidden_dim), lambda i: (0, 0)),          # b1
                pl.BlockSpec((hidden_dim, embed_dim), lambda i: (0, 0)),  # W2
                pl.BlockSpec((1, embed_dim), lambda i: (0, 0)),           # b2
            ],
            out_specs=pl.BlockSpec((tile_b, embed_dim), lambda i: (i, 0)),
        ),
        compiler_params=pltpu.CompilerParams(
            dimension_semantics=("parallel",),
        ),
    )(t, consts, w1, b1, w2, b2)

    if B_pad != B:
        out = out[:B]
    return out


# -----------------------------------------------------------------------------
# Module wrapper
# -----------------------------------------------------------------------------
def sinusoidal_pos_emb(t, dim):
    """Standard diffusion sinusoidal embedding. t: [B] -> [B, dim]."""
    half_dim = dim // 2
    scale = math.log(10000.0) / (half_dim - 1)
    freqs = jnp.exp(jnp.arange(half_dim, dtype=jnp.float32) * -scale)
    arg = t[:, None].astype(jnp.float32) * freqs[None, :]
    return jnp.concatenate([jnp.sin(arg), jnp.cos(arg)], axis=-1)


class DualTimestepEncoderPallas:
    def __init__(self, embed_dim=32, mlp_ratio=4.0, key=None):
        assert embed_dim % 2 == 0 and embed_dim >= 4, embed_dim
        self.embed_dim = embed_dim
        hidden_dim = int(embed_dim * mlp_ratio)
        self.hidden_dim = hidden_dim
        if key is None:
            key = jax.random.PRNGKey(42)
        k1, k2, k3, k4 = jax.random.split(key, 4)
        in_dim = embed_dim * 2
        # Deterministic synthetic init (PyTorch-default-like uniform fan-in scaling).
        lim1 = 1.0 / math.sqrt(in_dim)
        lim2 = 1.0 / math.sqrt(hidden_dim)
        self.w1 = jax.random.uniform(k1, (in_dim, hidden_dim), jnp.float32, -lim1, lim1)
        self.b1 = jax.random.uniform(k2, (1, hidden_dim), jnp.float32, -lim1, lim1)
        self.w2 = jax.random.uniform(k3, (hidden_dim, embed_dim), jnp.float32, -lim2, lim2)
        self.b2 = jax.random.uniform(k4, (1, embed_dim), jnp.float32, -lim2, lim2)

        # Per-lane embedding constants, built ONCE (not per call) and packed
        # into a single [3, 2E] array: (freq on t1 lanes | freq on t2 lanes |
        # pi/2 phase on cos lanes), matching the [sin1|cos1|sin2|cos2] concat.
        half = embed_dim // 2
        neg_scale = -math.log(10000.0) / (half - 1)
        idx = jnp.arange(in_dim)
        freq = jnp.exp((idx % half).astype(jnp.float32) * neg_scale)
        is_t2 = (idx >= embed_dim).astype(jnp.float32)
        is_cos = ((idx % embed_dim) >= half).astype(jnp.float32)
        self.consts = jnp.stack(
            [freq * (1.0 - is_t2), freq * is_t2, is_cos * (math.pi / 2.0)],
            axis=0).astype(jnp.float32)                       # [3, 2E]

        # One jit boundary around input prep + pallas_call + slice.
        self._fn = jax.jit(functools.partial(
            dual_timestep_encoder_pallas, embed_dim=embed_dim))

    def __call__(self, t1, t2):
        return self._fn(t1, t2, self.consts, self.w1, self.b1, self.w2, self.b2)

    # Pure-JAX reference for correctness checking.
    def reference(self, t1, t2):
        temb1 = sinusoidal_pos_emb(t1, self.embed_dim)
        temb2 = sinusoidal_pos_emb(t2, self.embed_dim)
        temb = jnp.concatenate([temb1, temb2], axis=-1)
        h = temb @ self.w1 + self.b1
        h = h * jnp.tanh(jax.nn.softplus(h))                  # Mish
        return h @ self.w2 + self.b2


if __name__ == "__main__":
    E = 32
    enc = DualTimestepEncoderPallas(embed_dim=E, mlp_ratio=4.0,
                                    key=jax.random.PRNGKey(42))

    key = jax.random.PRNGKey(0)
    kt1, kt2, kt3, kt4 = jax.random.split(key, 4)

    # Primary check: small batch (single grid step on every chip generation).
    B = 8
    t1 = jax.random.uniform(kt1, (B,), jnp.float32, 0.0, 1000.0)
    t2 = jax.random.uniform(kt2, (B,), jnp.float32, 0.0, 1000.0)
    out = jax.block_until_ready(enc(t1, t2))
    ref = jax.block_until_ready(enc.reference(t1, t2))
    assert out.shape == (B, E), out.shape
    assert bool(jnp.allclose(out, ref, atol=2e-3, rtol=2e-3)), \
        float(jnp.max(jnp.abs(out - ref)))

    # Secondary check: non-multiple-of-8 batch exercising row padding + slice.
    B2 = 19
    s1 = jax.random.uniform(kt3, (B2,), jnp.float32, 0.0, 1000.0)
    s2 = jax.random.uniform(kt4, (B2,), jnp.float32, 0.0, 1000.0)
    out2 = jax.block_until_ready(enc(s1, s2))
    ref2 = jax.block_until_ready(enc.reference(s1, s2))
    assert out2.shape == (B2, E), out2.shape
    assert bool(jnp.allclose(out2, ref2, atol=2e-3, rtol=2e-3)), \
        float(jnp.max(jnp.abs(out2 - ref2)))

    print("KERNEL_OK")
</pallas_src>

<mosaic_0001>
module attributes {stable_mosaic.version = 11 : i64} {
  func.func @_fused_kernel(%arg0: i32, %arg1: memref<8x2xf32, #tpu.memory_space<vmem>>, %arg2: memref<3x64xf32, #tpu.memory_space<vmem>>, %arg3: memref<64x128xf32, #tpu.memory_space<vmem>>, %arg4: memref<1x128xf32, #tpu.memory_space<vmem>>, %arg5: memref<128x32xf32, #tpu.memory_space<vmem>>, %arg6: memref<1x32xf32, #tpu.memory_space<vmem>>, %arg7: memref<8x32xf32, #tpu.memory_space<vmem>>) attributes {dimension_semantics = [#tpu.dimension_semantics<parallel>], iteration_bounds = array<i64: 1>, scalar_prefetch = 0 : i64, scratch_operands = 0 : i64, tpu.core_type = #tpu.core_type<tc>, window_params = [{transform_indices = @transform_0, window_bounds = array<i64: 8, 2>}, {pipeline_mode = #tpu.pipeline_mode<synchronous>, transform_indices = @transform_1, window_bounds = array<i64: 3, 64>}, {pipeline_mode = #tpu.pipeline_mode<synchronous>, transform_indices = @transform_2, window_bounds = array<i64: 64, 128>}, {pipeline_mode = #tpu.pipeline_mode<synchronous>, transform_indices = @transform_3, window_bounds = array<i64: 1, 128>}, {pipeline_mode = #tpu.pipeline_mode<synchronous>, transform_indices = @transform_4, window_bounds = array<i64: 128, 32>}, {pipeline_mode = #tpu.pipeline_mode<synchronous>, transform_indices = @transform_5, window_bounds = array<i64: 1, 32>}, {transform_indices = @transform_6, window_bounds = array<i64: 8, 32>}]} {
    %c0 = arith.constant 0 : index
    %c0_0 = arith.constant 0 : index
    %0 = vector.load %arg1[%c0, %c0_0] : memref<8x2xf32, #tpu.memory_space<vmem>>, vector<8x1xf32>
    %c0_1 = arith.constant 0 : index
    %c1 = arith.constant 1 : index
    %1 = vector.load %arg1[%c0_1, %c1] : memref<8x2xf32, #tpu.memory_space<vmem>>, vector<8x1xf32>
    %c0_2 = arith.constant 0 : index
    %c0_3 = arith.constant 0 : index
    %2 = vector.load %arg2[%c0_2, %c0_3] : memref<3x64xf32, #tpu.memory_space<vmem>>, vector<1x64xf32>
    %c1_4 = arith.constant 1 : index
    %c0_5 = arith.constant 0 : index
    %3 = vector.load %arg2[%c1_4, %c0_5] : memref<3x64xf32, #tpu.memory_space<vmem>>, vector<1x64xf32>
    %c2 = arith.constant 2 : index
    %c0_6 = arith.constant 0 : index
    %4 = vector.load %arg2[%c2, %c0_6] : memref<3x64xf32, #tpu.memory_space<vmem>>, vector<1x64xf32>
    %5 = vector.broadcast %0 : vector<8x1xf32> to vector<8x64xf32>
    %6 = vector.broadcast %2 : vector<1x64xf32> to vector<8x64xf32>
    %7 = arith.mulf %5, %6 : vector<8x64xf32>
    %8 = vector.broadcast %1 : vector<8x1xf32> to vector<8x64xf32>
    %9 = vector.broadcast %3 : vector<1x64xf32> to vector<8x64xf32>
    %10 = arith.mulf %8, %9 : vector<8x64xf32>
    %11 = arith.addf %7, %10 : vector<8x64xf32>
    %12 = vector.broadcast %4 : vector<1x64xf32> to vector<8x64xf32>
    %13 = arith.addf %11, %12 : vector<8x64xf32>
    %14 = math.sin %13 : vector<8x64xf32>
    %c0_7 = arith.constant 0 : index
    %c0_8 = arith.constant 0 : index
    %15 = vector.load %arg3[%c0_7, %c0_8] : memref<64x128xf32, #tpu.memory_space<vmem>>, vector<64x128xf32>
    %cst = arith.constant dense<0.000000e+00> : vector<8x128xf32>
    %16 = tpu.matmul %14, %15, %cst {dimension_numbers = #tpu.dot_dimension_numbers<[1], [0], [0], [1], [0, 0, 1, 1], [], []>} : vector<8x64xf32>, vector<64x128xf32>, vector<8x128xf32> -> vector<8x128xf32>
    %c0_9 = arith.constant 0 : index
    %c0_10 = arith.constant 0 : index
    %17 = vector.load %arg4[%c0_9, %c0_10] : memref<1x128xf32, #tpu.memory_space<vmem>>, vector<1x128xf32>
    %18 = vector.broadcast %17 : vector<1x128xf32> to vector<8x128xf32>
    %19 = arith.addf %16, %18 : vector<8x128xf32>
    %cst_11 = arith.constant 2.000000e+01 : f32
    %20 = vector.broadcast %cst_11 : f32 to vector<8x128xf32>
    %21 = arith.minimumf %19, %20 : vector<8x128xf32>
    %22 = math.exp %21 : vector<8x128xf32>
    %cst_12 = arith.constant 1.000000e+00 : f32
    %23 = vector.broadcast %cst_12 : f32 to vector<8x128xf32>
    %24 = arith.addf %23, %22 : vector<8x128xf32>
    %cst_13 = arith.constant 1.000000e+00 : f32
    %25 = vector.broadcast %cst_13 : f32 to vector<8x128xf32>
    %26 = arith.addf %25, %22 : vector<8x128xf32>
    %27 = arith.mulf %24, %26 : vector<8x128xf32>
    %cst_14 = arith.constant 1.000000e+00 : f32
    %28 = vector.broadcast %cst_14 : f32 to vector<8x128xf32>
    %29 = arith.subf %27, %28 : vector<8x128xf32>
    %cst_15 = arith.constant 1.000000e+00 : f32
    %30 = vector.broadcast %cst_15 : f32 to vector<8x128xf32>
    %31 = arith.addf %27, %30 : vector<8x128xf32>
    %32 = tpu.reciprocal %31 {approx = true} : vector<8x128xf32> -> vector<8x128xf32>
    %33 = arith.mulf %29, %32 : vector<8x128xf32>
    %34 = arith.mulf %19, %33 : vector<8x128xf32>
    %c0_16 = arith.constant 0 : index
    %c0_17 = arith.constant 0 : index
    %35 = vector.load %arg5[%c0_16, %c0_17] : memref<128x32xf32, #tpu.memory_space<vmem>>, vector<128x32xf32>
    %cst_18 = arith.constant dense<0.000000e+00> : vector<8x32xf32>
    %36 = tpu.matmul %34, %35, %cst_18 {dimension_numbers = #tpu.dot_dimension_numbers<[1], [0], [0], [1], [0, 0, 1, 1], [], []>} : vector<8x128xf32>, vector<128x32xf32>, vector<8x32xf32> -> vector<8x32xf32>
    %c0_19 = arith.constant 0 : index
    %c0_20 = arith.constant 0 : index
    %37 = vector.load %arg6[%c0_19, %c0_20] : memref<1x32xf32, #tpu.memory_space<vmem>>, vector<1x32xf32>
    %38 = vector.broadcast %37 : vector<1x32xf32> to vector<8x32xf32>
    %39 = arith.addf %36, %38 : vector<8x32xf32>
    %c0_21 = arith.constant 0 : index
    %c0_22 = arith.constant 0 : index
    %40 = vector.load %arg7[%c0_21, %c0_22] : memref<8x32xf32, #tpu.memory_space<vmem>>, vector<8x32xf32>
    tpu.vector_store %arg7[%c0_21, %c0_22], %39 {strides = array<i32>} : memref<8x32xf32, #tpu.memory_space<vmem>>, vector<8x32xf32>,
    return
  }
  func.func @transform_0(%arg0: i32) -> (i32, i32) {
    %c0_i32 = arith.constant 0 : i32
    %c0_i32_0 = arith.constant 0 : i32
    return %arg0, %c0_i32 : i32, i32
  }
  func.func @transform_1(%arg0: i32) -> (i32, i32) {
    %c0_i32 = arith.constant 0 : i32
    %c0_i32_0 = arith.constant 0 : i32
    %c0_i32_1 = arith.constant 0 : i32
    return %c0_i32, %c0_i32_0 : i32, i32
  }
  func.func @transform_2(%arg0: i32) -> (i32, i32) {
    %c0_i32 = arith.constant 0 : i32
    %c0_i32_0 = arith.constant 0 : i32
    %c0_i32_1 = arith.constant 0 : i32
    return %c0_i32, %c0_i32_0 : i32, i32
  }
  func.func @transform_3(%arg0: i32) -> (i32, i32) {
    %c0_i32 = arith.constant 0 : i32
    %c0_i32_0 = arith.constant 0 : i32
    %c0_i32_1 = arith.constant 0 : i32
    return %c0_i32, %c0_i32_0 : i32, i32
  }
  func.func @transform_4(%arg0: i32) -> (i32, i32) {
    %c0_i32 = arith.constant 0 : i32
    %c0_i32_0 = arith.constant 0 : i32
    %c0_i32_1 = arith.constant 0 : i32
    return %c0_i32, %c0_i32_0 : i32, i32
  }
  func.func @transform_5(%arg0: i32) -> (i32, i32) {
    %c0_i32 = arith.constant 0 : i32
    %c0_i32_0 = arith.constant 0 : i32
    %c0_i32_1 = arith.constant 0 : i32
    return %c0_i32, %c0_i32_0 : i32, i32
  }
  func.func @transform_6(%arg0: i32) -> (i32, i32) {
    %c0_i32 = arith.constant 0 : i32
    %c0_i32_0 = arith.constant 0 : i32
    return %arg0, %c0_i32 : i32, i32
  }
}

</mosaic_0001>

<bundles_post_ra>
// kernel: dual_timestep_encoder_pallas.1
= control target key start
LH: loop header
LB: loop body
LE: loop exit
PB: predicated region body
PF: predicated region fallthrough
CT: control target
= control target key end

     0   :  { %v503_v1 = vmov 0   ;;  %s689_s0 = inlined_call_operand.vmem [shape: f32[8,2], index: 0, kind: input, shape index: {}]   ;;  %s690_s1 = inlined_call_operand.vmem [shape: f32[3,64], index: 1, kind: input, shape index: {}]   ;;  %s691_s2 = inlined_call_operand.vmem [shape: f32[64,128], index: 2, kind: input, shape index: {}]   ;;  %s692_s3 = inlined_call_operand.vmem [shape: f32[1,128], index: 3, kind: input, shape index: {}]   ;;  %s693_s4 = inlined_call_operand.vmem [shape: f32[128,32], index: 4, kind: input, shape index: {}]   ;;  %s694_s5 = inlined_call_operand.vmem [shape: f32[1,32], index: 5, kind: input, shape index: {}]   ;;  %s695_s6 = inlined_call_operand.hbm [shape: f32[8,32], index: 6, kind: output, shape index: {}]  }
   0x1   :  { %v24_v0 = vld [vmem:[%s689_s0] sm:$0xff]  ;;  %471 = vset.pattern.permute.xlu0 %v503_v1 }
   0x2   :  { %30 = vperm.xlu0 %471, %v24_v0  }
   0x3   :  { %11 = vsyncpa [#allocation3], 0  ;;  %v504_v2 = vmov 1   ;;  %v164_v3 = vld [vmem:[%s691_s2 + $0x38] sm:$0xff]  ;;  %v505_v4 = vmov 0.0   ;;  %v163_v5 = vld [vmem:[%s691_s2 + $0x30] sm:$0xff] }
   0x4   :  { %402 = vmatprep.subr.mxu0 %v505_v4  ;;  %vm506_vm0 = vmmov 0   ;;  %421 = vmatprep.subr.mxu1 %v505_v4  ;;  %v162_v6 = vld [vmem:[%s691_s2 + $0x28] sm:$0xff]  ;;  %v161_v7 = vld [vmem:[%s691_s2 + $0x20] sm:$0xff]  ;;  %v160_v8 = vld [vmem:[%s691_s2 + $0x18] sm:$0xff]  ;;  %v507_v32 = vmov 2102212464  }
   0x5   :  { %418 = vmatprep.mubr.msk.f32.mxu0 %vm506_vm0, %v505_v4  ;;  %403 = vmatpush3.msra.mxu0 %v164_v3  ;;  %v159_v9 = vld [vmem:[%s691_s2 + $0x10] sm:$0xff]  ;;  %v158_v10 = vld [vmem:[%s691_s2 + $0x8] sm:$0xff]  ;;  %v157_v11 = vld [vmem:[%s691_s2] sm:$0xff]  ;;  %v508_v34 = vmov 920167782   ;;  %vm172_vm13 = vcmask 523264  }
   0x6   :  { %472 = vset.pattern.permute.xlu0 %v504_v2  ;;  %404 = vmatprep.subr.mxu0 %v505_v4  ;;  %v365_v13 = vld [vmem:[%s690_s1] ss:$0 sm:$0xff]  ;;  %v366_v14 = vld [vmem:[%s690_s1 + $0x1] ss:$0 sm:$0xff]  ;;  %v367_v18 = vld [vmem:[%s690_s1 + $0x2] ss:$0 sm:$0xff] }
   0x7   :  { %39 = vperm.xlu0 %472, %v24_v0   ;;  %453 = vmatprep.mubr.msk.f32.mxu1 %vm506_vm0, %v505_v4  ;;  %v509_v38 = vmov 1326507024   ;;  %v510_v40 = vmov 683565275   ;;  %v511_v42 = vmov 2475754826  }
   0x8   :  { %405 = vmatpush3.msra.mxu0 %v163_v5  ;;  %v512_v45 = vmov 2131351028   ;;  %vm349_vm15 = vcmask 261120  }
   0x9   :  { %406 = vmatprep.subr.mxu0 %v505_v4 }
   0xa   :  { %407 = vmatpush3.msra.mxu0 %v162_v6 }
   0xb   :  { %408 = vmatprep.subr.mxu0 %v505_v4 }
   0xc   :  { %409 = vmatpush3.msra.mxu0 %v161_v7 }
   0xd   :  { %410 = vmatprep.subr.mxu0 %v505_v4 }
   0xe   :  { %411 = vmatpush3.msra.mxu0 %v160_v8 }
   0xf   :  { %412 = vmatprep.subr.mxu0 %v505_v4 }
  0x10   :  { %413 = vmatpush3.msra.mxu0 %v159_v9 }
  0x11   :  { %414 = vmatprep.subr.mxu0 %v505_v4 }
  0x12   :  { %415 = vmatpush3.msra.mxu0 %v158_v10 }
  0x13   :  { %416 = vmatprep.subr.mxu0 %v505_v4 }
  0x14   :  { %417 = vmatpush3.msra.mxu0 %v157_v11 }
  0x7d   :  { %v31_v12 = vpop.permute.xlu0 %30 }
  0x7e   :  { %v37_v16 = vmul.f32 %v365_v13, %v31_v12 }
  0x82   :  { %v40_v15 = vpop.permute.xlu0 %39 }
  0x83   :  { %v46_v17 = vmul.f32 %v366_v14, %v40_v15 }
  0x85   :  { %v47_v19 = vadd.f32 %v46_v17, %v37_v16 }
  0x87   :  { %v596_v20 = vadd.f32 %v367_v18, %v47_v19 }
  0x89   :  { %v56_v21 = vand.u32 2139095040, %v596_v20  ;;  %v53_v22 = vand.u32 2147483647, %v596_v20  ;;  %vm55_vm8 = vcmp.lt.s32.totalorder %v596_v20, 0  ;;  %vm145_vm14 = vweird.f32 %v596_v20 }
  0x8b   :  { %v57_v23 = vshrl.u32 %v56_v21, 23  ;;  %v60_v25 = vand.u32 8388607, %v53_v22  ;;  %vm54_vm9 = vcmp.le.f32.partialorder %v53_v22, 0.7853982 }
  0x8d   :  { %v368_v24 = vadd.s32 4294967169, %v57_v23  ;;  %v61_v28 = vor.u32 8388608, %v60_v25 }
  0x8f   :  { %v63_v26 = vadd.s32 1, %v368_v24  ;;  %v101_v36 = vshll.u32 %v61_v28, 8 }
  0x91   :  { %vm64_vm1 = vcmp.gt.s32.totalorder %v63_v26, 0 }
  0x92   :  { %v65_v27 = vsel %vm64_vm1, %v63_v26, 0 }
  0x93   :  { %v67_v29 = vand.u32 31, %v65_v27  ;;  %v66_v30 = vshrl.u32 %v65_v27, 5 }
  0x95   :  { %v68_v31 = vsub.s32 32, %v67_v29  ;;  %v79_v33 = vshll.u32 %v507_v32, %v67_v29  ;;  %v82_v35 = vshll.u32 %v508_v34, %v67_v29  ;;  %v70_v41 = vshll.u32 %v510_v40, %v67_v29 }
  0x96   :  { %v73_v44 = vshll.u32 %v511_v42, %v67_v29  ;;  %v76_v47 = vshll.u32 %v512_v45, %v67_v29  ;;  %vm88_vm2 = vcmp.lt.s32.totalorder %v66_v30, 4  ;;  %vm85_vm3 = vcmp.lt.s32.totalorder %v66_v30, 1 }
  0x97   :  { %v80_v37 = vshrl.u32 %v508_v34, %v68_v31  ;;  %v83_v39 = vshrl.u32 %v509_v38, %v68_v31  ;;  %v71_v43 = vshrl.u32 %v511_v42, %v68_v31  ;;  %v74_v46 = vshrl.u32 %v512_v45, %v68_v31 }
  0x98   :  { %v77_v48 = vshrl.u32 %v507_v32, %v68_v31  ;;  %v69_v52 = vshrl.u32 %v510_v40, %v68_v31  ;;  %vm86_vm4 = vcmp.lt.s32.totalorder %v66_v30, 2  ;;  %vm87_vm5 = vcmp.lt.s32.totalorder %v66_v30, 3 }
  0x99   :  { %v81_v49 = vor.u32 %v80_v37, %v79_v33  ;;  %v84_v50 = vor.u32 %v83_v39, %v82_v35  ;;  %v72_v51 = vor.u32 %v71_v43, %v70_v41  ;;  %v75_v53 = vor.u32 %v74_v46, %v73_v44 }
  0x9a   :  { %v78_v54 = vor.u32 %v77_v48, %v76_v47 }
  0x9b   :  { %v94_v55 = vsel %vm88_vm2, %v81_v49, 920167782  ;;  %v98_v56 = vsel %vm88_vm2, %v84_v50, 1326507024  ;;  %v93_v58 = vsel %vm85_vm3, %v72_v51, %v75_v53  ;;  %v89_v61 = vsel %vm85_vm3, %v69_v52, %v72_v51  ;;  %v271_v50 = vld [vmem:[%s693_s4 + $0x78] sm:$0xff]  ;;  %v270_v51 = vld [vmem:[%s693_s4 + $0x70] sm:$0xff] }
  0x9c   :  { %v90_v57 = vsel %vm88_vm2, %v78_v54, 2102212464  ;;  %v95_v59 = vsel %vm87_vm5, %v78_v54, %v94_v55  ;;  %v97_v60 = vsel %vm85_vm3, %v75_v53, %v78_v54  ;;  %v99_v0 = vsel %vm87_vm5, %v81_v49, %v98_v56  ;;  %422 = vmatpush3.msra.mxu1 %v271_v50  ;;  %v268_v52 = vld [vmem:[%s693_s4 + $0x60] sm:$0xff]  ;;  %v266_v54 = vld [vmem:[%s693_s4 + $0x50] sm:$0xff]  ;;  %v265_v55 = vld [vmem:[%s693_s4 + $0x48] sm:$0xff] }
  0x9d   :  { %v91_v62 = vsel %vm87_vm5, %v75_v53, %v90_v57  ;;  %v96_v63 = vsel %vm86_vm4, %v93_v58, %v95_v59  ;;  %v100_v1 = vsel %vm86_vm4, %v97_v60, %v99_v0  ;;  %423 = vmatprep.subr.mxu1 %v505_v4  ;;  %v267_v53 = vld [vmem:[%s693_s4 + $0x58] sm:$0xff]  ;;  %v264_v56 = vld [vmem:[%s693_s4 + $0x40] sm:$0xff]  ;;  %v262_v58 = vld [vmem:[%s693_s4 + $0x30] sm:$0xff] }
  0x9e   :  { %v602_v2 = vmul.u32.u64.low %v101_v36, %v96_v63  ;;  %v603_v3 = vmul.u32.u64.high %v101_v36, %v96_v63, %v602_v2  ;;  %v605_v5 = vmul.u32.u64.low %v101_v36, %v100_v1  ;;  %v606_v6 = vmul.u32.u64.high %v101_v36, %v100_v1, %v605_v5  ;;  %424 = vmatpush3.msra.mxu1 %v270_v51  ;;  %v263_v57 = vld [vmem:[%s693_s4 + $0x38] sm:$0xff]  ;;  %v261_v59 = vld [vmem:[%s693_s4 + $0x28] sm:$0xff]  ;;  %v260_v60 = vld [vmem:[%s693_s4 + $0x20] sm:$0xff] }
  0x9f   :  { %v92_v7 = vsel %vm86_vm4, %v89_v61, %v91_v62  ;;  %425 = vmatprep.subr.mxu1 %v505_v4  ;;  %v259_v61 = vld [vmem:[%s693_s4 + $0x18] sm:$0xff]  ;;  %v258_v62 = vld [vmem:[%s693_s4 + $0x10] sm:$0xff]  ;;  %v257_v63 = vld [vmem:[%s693_s4 + $0x8] sm:$0xff] }
  0xa0   :  { %v111_v8 = vadd.s32 1, %v603_v3  ;;  %v108_v9 = vmul.u32 %v101_v36, %v92_v7  ;;  %vm110_vm6 = vc.u32 %v606_v6, %v602_v2  ;;  %v109_v23 = vadd.s32 %v602_v2, %v606_v6  ;;  %v256_v0 = vld [vmem:[%s693_s4] sm:$0xff] }
  0xa1   :  { %v372_v1 = vld [vmem:[%s692_s3] ss:$0 sm:$0xff]  ;;  %s513_s3 = smov [#allocation2]  }
  0xa2   :  { %v112_v10 = vsel %vm110_vm6, %v111_v8, %v603_v3  ;;  %s357_s26 = sshll.u32 %s513_s3, 4  ;;  %s358_s26 = int_to_ptr.vmem [resolvable:$true] %s357_s26 }
  0xa3   :  { %v113_v11 = vadd.s32 %v112_v10, %v108_v9  ;;  %s481_s0 = scalar_lea.vmem %s358_s26, 128  ;;  %p486_p1 = scmp.lt.s32.totalorder %s358_s26, %s358_s26 }
  0xa4   :  { %p482_p0 = scmp.ne.s32.totalorder %s358_s26, %s481_s0  ;;  %p487_p2 = scmp.lt.s32.totalorder %s481_s0, %s481_s0 }
  0xa5   :  { %v114_v12 = vadd.s32 536870912, %v113_v11 }
  0xa6   :  { %p488_p3 = por %p487_p2, %p486_p1 }
  0xa7   :  { %v115_v13 = vshrl.u32 %v114_v12, 30 }
  0xa8   :  { %p489_p4 = pnand %p488_p3, %p482_p0 }
  0xa9   :  { %v116_v14 = vshll.u32 %v115_v13, 30  ;;  %v139_v36 = vsub.s32 4, %v115_v13 }
  0xab   :  { %v117_v15 = vsub.s32 %v113_v11, %v116_v14  ;;  %v140_v39 = vsel %vm55_vm8, %v139_v36, %v115_v13 }
  0xac   :  { %v142_v40 = vsel %vm54_vm9, 0, %v140_v39 }
  0xad   :  { %v119_v16 = vsub.s32 0, %v117_v15  ;;  %v146_v41 = vadd.s32 3, %v142_v40 }
  0xaf   :  { %v369_v17 = vmin.u32 %v119_v16, %v117_v15  ;;  %v147_v42 = vand.u32 3, %v146_v41 }
  0xb1   :  { %v121_v18 = vclz %v369_v17  ;;  %vm152_vm10 = vcmp.eq.s32.totalorder %v147_v42, 2  ;;  %vm149_vm11 = vcmp.eq.s32.totalorder %v147_v42, 0  ;;  %vm148_vm12 = vcmp.lt.s32.totalorder %v147_v42, 2 }
  0xb3   :  { %v370_v19 = vadd.s32 4294967294, %v121_v18 }
  0xb5   :  { %vm371_vm7 = vcmp.lt.s32.totalorder %v370_v19, 0 }
  0xb6   :  { %v124_v21 = vsel %vm371_vm7, 0, %v370_v19 }
  0xb7   :  { %v125_v24 = vsub.s32 32, %v124_v21  ;;  %v129_v25 = vsub.s32 4294967266, %v124_v21  ;;  %v126_v26 = vshll.u32 %v117_v15, %v124_v21  ;;  %v375_v15 = vld [vmem:[%s694_s5] ss:$0 sm:$0xff] }
  0xb9   :  { %v127_v27 = vshrl.u32 %v109_v23, %v125_v24  ;;  %v130_v28 = vadd.s32 127, %v129_v25 }
  0xbb   :  { %v128_v29 = vor.u32 %v127_v27, %v126_v26  ;;  %v131_v30 = vshll.u32 %v130_v28, 23 }
  0xbd   :  { %v132_v31 = vor.u32 4788187, %v131_v30  ;;  %v135_v33 = vcvt.s32.f32 %v128_v29 }
  0xbf   :  { %v133_v32 = vand.u32 2147483647, %v132_v31 }
  0xc1   :  { %v136_v34 = vmul.f32 %v135_v33, %v133_v32 }
  0xc3   :  { %v137_v35 = vxor.u32 2147483648, %v136_v34 }
  0xc5   :  { %v138_v37 = vsel %vm55_vm8, %v137_v35, %v136_v34 }
  0xc6   :  { %v141_v38 = vsel %vm54_vm9, %v596_v20, %v138_v37  ;;  %v269_v20 = vld [vmem:[%s693_s4 + $0x68] sm:$0xff] }
  0xc7   :  { %473 = vcosq.f32 %v141_v38  ;;  %426 = vmatpush3.msra.mxu1 %v269_v20 }
  0xc8   :  { %475 = vsinq.f32 %v141_v38  ;;  %427 = vmatprep.subr.mxu1 %v505_v4 }
  0xc9   :  { %428 = vmatpush3.msra.mxu1 %v268_v52 }
  0xca   :  { %429 = vmatprep.subr.mxu1 %v505_v4 }
  0xcb   :  { %430 = vmatpush3.msra.mxu1 %v267_v53 }
  0xcc   :  { %431 = vmatprep.subr.mxu1 %v505_v4 }
  0xcd   :  { %432 = vmatpush3.msra.mxu1 %v266_v54 }
  0xce   :  { %433 = vmatprep.subr.mxu1 %v505_v4 }
  0xcf   :  { %434 = vmatpush3.msra.mxu1 %v265_v55 }
  0xd0   :  { %435 = vmatprep.subr.mxu1 %v505_v4 }
  0xd1   :  { %436 = vmatpush3.msra.mxu1 %v264_v56 }
  0xd2   :  { %437 = vmatprep.subr.mxu1 %v505_v4 }
  0xd3   :  { %438 = vmatpush3.msra.mxu1 %v263_v57 }
  0xd4   :  { %v474_v43 = vpop.eup %473  ;;  %439 = vmatprep.subr.mxu1 %v505_v4 }
  0xd5   :  { %v476_v44 = vpop.eup %475  ;;  %v153_v45 = vxor.u32 2147483648, %v474_v43  ;;  %440 = vmatpush3.msra.mxu1 %v262_v58 }
  0xd6   :  { %v150_v46 = vxor.u32 2147483648, %v476_v44  ;;  %441 = vmatprep.subr.mxu1 %v505_v4 }
  0xd7   :  { %v154_v47 = vsel %vm152_vm10, %v153_v45, %v476_v44  ;;  %442 = vmatpush3.msra.mxu1 %v261_v59 }
  0xd8   :  { %v151_v48 = vsel %vm149_vm11, %v474_v43, %v150_v46  ;;  %443 = vmatprep.subr.mxu1 %v505_v4 }
  0xd9   :  { %v155_v22 = vsel %vm148_vm12, %v151_v48, %v154_v47  ;;  %444 = vmatpush3.msra.mxu1 %v260_v60 }
  0xda   :  { %v156_v49 = vsel %vm145_vm14, nan, %v155_v22  ;;  %445 = vmatprep.subr.mxu1 %v505_v4 }
  0xdb   :  { %419 = vmatmul.mubr.msk.f32.vlgmr.msra.gmra.mxu0 %vm172_vm13, %v156_v49  ;;  %446 = vmatpush3.msra.mxu1 %v259_v61 }
  0xdc   :  { %447 = vmatprep.subr.mxu1 %v505_v4 }
  0xdd   :  { %448 = vmatpush3.msra.mxu1 %v258_v62 }
  0xde   :  { %449 = vmatprep.subr.mxu1 %v505_v4 }
  0xdf   :  { %450 = vmatpush3.msra.mxu1 %v257_v63 }
  0xe0   :  { %451 = vmatprep.subr.mxu1 %v505_v4 }
  0xe1   :  { %452 = vmatpush3.msra.mxu1 %v256_v0 }
 0x19b   :  { %v242_v2 = vpop.f32.mrf.mxu0 }
 0x19c   :  { %v243_v3 = vadd.f32 %v372_v1, %v242_v2 }
 0x19d   :  { %v420_v5 = vpop.f32.mrf.mxu0 }
 0x19e   :  { %v246_v6 = vmin.f32 %v243_v3, 20.0 }
 0x1a0   :  { %v247_v7 = vmul.f32 1.442695, %v246_v6 }
 0x1a2   :  { %477 = vpow2.f32 %v247_v7 }
 0x1af   :  { %v478_v8 = vpop.eup %477 }
 0x1b0   :  { %v249_v9 = vadd.f32 1.0, %v478_v8 }
 0x1b2   :  { %v250_v10 = vmul.f32 %v249_v9, %v249_v9 }
 0x1b4   :  { %v252_v11 = vadd.f32 1.0, %v250_v10  ;;  %v374_v12 = vadd.f32 -1.0, %v250_v10 }
 0x1b6   :  { %479 = vrcp.f32 %v252_v11 }
 0x1c3   :  { %v480_v13 = vpop.eup %479 }
 0x1c4   :  { %v254_v14 = vmul.f32 %v480_v13, %v374_v12 }
 0x1c6   :  { %v255_v4 = vmul.f32 %v254_v14, %v243_v3 }
 0x1c8   :  { %454 = vmatmul.mubr.f32.vlgmr.msra.gmra.mxu1 %v255_v4 }
 0x288   :  { %v345_v16 = vpop.f32.mrf.mxu1 }
 0x289   :  { %v346_v17 = vadd.f32 %v375_v15, %v345_v16 }
 0x28a   :  { %v455_v18 = vpop.f32.mrf.mxu1 }
 0x28b   :  { %350 = vst.msk [vmem:[#allocation2] sm:$0xff] %vm349_vm15, %v346_v17 }
 0x28c   :  { %492 = shalt.err (!%p489_p4)
}
 0x28d   :  { %360 = dma.vmem_to_hbm [thread:$0]  %s358_s26, 128, %s695_s6, [#allocation3]  }
 0x28e   :  { %501 = dma.done.wait [#allocation3], 128  }
 0x28f   :  { %502 = vsyncadd [#allocation3], 4294967168 }
 0x290   :  { %364 = vsyncpa [#allocation3], 1 }

</bundles_post_ra>
